<compile_context>
chip_gen: v7x
topology: tpu7x:2x2x1
jax: 0.10.0
libtpu: 0.0.40
codegen_flags: <defaults>
</compile_context>

<pallas_src>
import jax
import jax.numpy as jnp
from jax.experimental import pallas as pl
from jax.experimental.pallas import tpu as pltpu

LANE = 128
SUBLANE_PACK = 16   # bf16 packs 16 rows / vreg; round batch tiles to this


def _round_up(x, m):
    return (x + m - 1) // m * m


def _cdiv(a, b):
    return -(-a // b)


def _pad2(x, shape):
    return jnp.pad(x, ((0, shape[0] - x.shape[0]), (0, shape[1] - x.shape[1])))


# ----------------------------------------------------------------------------
# Kernel
# ----------------------------------------------------------------------------
def _query_net_kernel(q_ref, w1_ref, b1_ref, w2_ref, b2_ref, w3_ref, b3_ref,
                      o_ref):
    # One batch tile: 3 chained matmuls (MXU, f32 accumulation) + 2 ReLUs.
    # Weights/biases are VMEM-resident across all grid steps (constant
    # index_map); only the query/output tiles stream.
    x = q_ref[...].astype(w1_ref.dtype)                       # f32 -> bf16 in-kernel

    h1 = jnp.dot(x, w1_ref[...], preferred_element_type=jnp.float32)
    h1 = jnp.maximum(h1 + b1_ref[...], 0.0)                   # f32 epilogue

    h2 = jnp.dot(h1.astype(w2_ref.dtype), w2_ref[...],
                 preferred_element_type=jnp.float32)
    h2 = jnp.maximum(h2 + b2_ref[...], 0.0)

    h3 = jnp.dot(h2.astype(w3_ref.dtype), w3_ref[...],
                 preferred_element_type=jnp.float32)
    o_ref[...] = (h3 + b3_ref[...]).astype(o_ref.dtype)


# ----------------------------------------------------------------------------
# One-time parameter prep (hoisted out of the per-forward path)
# ----------------------------------------------------------------------------
def prepare_params(params, matmul_dtype=jnp.bfloat16):
    """Pad the hidden dim to 128 lanes (zero pad -> inert after ReLU) and cast
    weights to the MXU dtype.  Call once; reuse the result for every forward."""
    w1, b1, w2, b2, w3, b3 = params
    H, mid = w1.shape
    out_size = w3.shape[1]
    assert w2.shape == (mid, out_size) and w3.shape == (out_size, out_size)

    mid_p = _round_up(mid, LANE)

    w1p = _pad2(w1, (H, mid_p)).astype(matmul_dtype)
    w2p = _pad2(w2, (mid_p, out_size)).astype(matmul_dtype)
    w3p = w3.astype(matmul_dtype)
    b1p = _pad2(b1.reshape(1, -1), (1, mid_p)).astype(jnp.float32)
    b2p = b2.reshape(1, -1).astype(jnp.float32)
    b3p = b3.reshape(1, -1).astype(jnp.float32)
    return (w1p, b1p, w2p, b2p, w3p, b3p)


def _choose_tile(B, block_b):
    """Balance steps and minimize batch padding; keep >=2 steps for large B so
    v7x's two TensorCores both get work."""
    n_steps = max(1, _cdiv(B, block_b))
    if n_steps == 1 and B > 256:
        n_steps = 2
    tb = _round_up(_cdiv(B, n_steps), SUBLANE_PACK)
    b_pad = _round_up(B, tb)
    return tb, b_pad


# ----------------------------------------------------------------------------
# Forward
# ----------------------------------------------------------------------------
def query_network_forward(query, prepared_params, num_queries, num_keys, *,
                          block_b=2048):
    """query: (B, hidden_size) float32. Returns (B, num_queries, num_keys) f32."""
    w1p, b1p, w2p, b2p, w3p, b3p = prepared_params
    B, H = query.shape
    out_size = num_queries * num_keys
    mid_p = w1p.shape[1]
    assert w1p.shape[0] == H and w3p.shape == (out_size, out_size)

    tb, b_pad = _choose_tile(B, block_b)
    qp = query if b_pad == B else jnp.pad(query, ((0, b_pad - B), (0, 0)))
    grid = (b_pad // tb,)

    weight_bytes = (w1p.size + w2p.size + w3p.size) * 2 + \
                   (b1p.size + b2p.size + b3p.size) * 4
    cost = pl.CostEstimate(
        flops=2 * b_pad * (H * mid_p + mid_p * out_size + out_size * out_size),
        transcendentals=0,
        bytes_accessed=b_pad * H * 4 + b_pad * out_size * 4 + weight_bytes,
    )

    out_padded = pl.pallas_call(
        _query_net_kernel,
        out_shape=jax.ShapeDtypeStruct((b_pad, out_size), jnp.float32),
        grid_spec=pltpu.PrefetchScalarGridSpec(
            num_scalar_prefetch=0,
            grid=grid,
            in_specs=[
                # Query: one f32 batch tile per step (double-buffered).
                pl.BlockSpec((tb, H), lambda i: (i, 0)),
                # Weights / biases: full-array blocks, same index every step
                # -> DMA'd once, VMEM-resident across the whole grid.
                pl.BlockSpec((H, mid_p), lambda i: (0, 0)),
                pl.BlockSpec((1, mid_p), lambda i: (0, 0)),
                pl.BlockSpec((mid_p, out_size), lambda i: (0, 0)),
                pl.BlockSpec((1, out_size), lambda i: (0, 0)),
                pl.BlockSpec((out_size, out_size), lambda i: (0, 0)),
                pl.BlockSpec((1, out_size), lambda i: (0, 0)),
            ],
            out_specs=pl.BlockSpec((tb, out_size), lambda i: (i, 0)),
        ),
        compiler_params=pltpu.CompilerParams(
            dimension_semantics=("parallel",),   # megacore sharding on v7x
        ),
        cost_estimate=cost,
    )(qp, w1p, b1p, w2p, b2p, w3p, b3p)

    out = out_padded if b_pad == B else out_padded[:B]
    return out.reshape(-1, num_queries, num_keys)


# ----------------------------------------------------------------------------
# Synthetic init + pure-JAX reference
# ----------------------------------------------------------------------------
def init_params(key, hidden_size, num_queries, num_keys):
    """Deterministic synthetic init. Weights stored pre-transposed as (in, out)."""
    out_size = num_queries * num_keys
    mid = hidden_size // 2
    k1, k2, k3 = jax.random.split(key, 3)
    scale = 0.1
    w1 = scale * jax.random.normal(k1, (hidden_size, mid), jnp.float32)
    b1 = jnp.zeros((1, mid), jnp.float32)
    w2 = scale * jax.random.normal(k2, (mid, out_size), jnp.float32)
    b2 = jnp.zeros((1, out_size), jnp.float32)
    w3 = scale * jax.random.normal(k3, (out_size, out_size), jnp.float32)
    b3 = jnp.zeros((1, out_size), jnp.float32)
    return (w1, b1, w2, b2, w3, b3)


def _reference(query, params):
    w1, b1, w2, b2, w3, b3 = params
    h = jnp.maximum(query @ w1 + b1, 0.0)
    h = jnp.maximum(h @ w2 + b2, 0.0)
    return h @ w3 + b3


if __name__ == "__main__":
    hidden_size = 32
    num_queries = 4
    num_keys = 8

    key = jax.random.PRNGKey(0)
    k_in, k_p, k_in2 = jax.random.split(key, 3)
    params = init_params(k_p, hidden_size, num_queries, num_keys)
    prepared = prepare_params(params)            # one-time pad + bf16 cast

    # --- Small-shape check (B=2), single grid step. -------------------------
    batch = 2
    query = jax.random.normal(k_in, (batch, hidden_size), jnp.float32)
    out = query_network_forward(query, prepared, num_queries, num_keys)
    out = jax.block_until_ready(out)
    assert out.shape == (batch, num_queries, num_keys), out.shape

    ref = _reference(query, params).reshape(-1, num_queries, num_keys)
    # bf16 MXU inputs -> loosened tolerance vs. the pure-f32 reference.
    assert jnp.allclose(out, ref, atol=2e-2, rtol=2e-2), "mismatch vs reference"

    # --- Multi-tile check (exercises the batch grid + padding slice). -------
    batch2 = 300
    query2 = jax.random.normal(k_in2, (batch2, hidden_size), jnp.float32)
    out2 = query_network_forward(query2, prepared, num_queries, num_keys,
                                 block_b=128)   # grid = (3,), tb=112
    out2 = jax.block_until_ready(out2)
    assert out2.shape == (batch2, num_queries, num_keys), out2.shape
    ref2 = _reference(query2, params).reshape(-1, num_queries, num_keys)
    assert jnp.allclose(out2, ref2, atol=2e-2, rtol=2e-2), "mismatch (tiled)"

    # --- Large-batch check at the default tile (2 steps, balanced). ---------
    batch3 = 1000
    query3 = jax.random.normal(k_in, (batch3, hidden_size), jnp.float32)
    out3 = jax.block_until_ready(
        query_network_forward(query3, prepared, num_queries, num_keys))
    ref3 = _reference(query3, params).reshape(-1, num_queries, num_keys)
    assert out3.shape == (batch3, num_queries, num_keys), out3.shape
    assert jnp.allclose(out3, ref3, atol=2e-2, rtol=2e-2), "mismatch (large)"

    print("KERNEL_OK")
</pallas_src>

<mosaic_0001>
module attributes {stable_mosaic.version = 11 : i64} {
  func.func @_query_net_kernel(%arg0: i32, %arg1: memref<16x32xf32, #tpu.memory_space<vmem>>, %arg2: memref<32x128xbf16, #tpu.memory_space<vmem>>, %arg3: memref<1x128xf32, #tpu.memory_space<vmem>>, %arg4: memref<128x32xbf16, #tpu.memory_space<vmem>>, %arg5: memref<1x32xf32, #tpu.memory_space<vmem>>, %arg6: memref<32x32xbf16, #tpu.memory_space<vmem>>, %arg7: memref<1x32xf32, #tpu.memory_space<vmem>>, %arg8: memref<16x32xf32, #tpu.memory_space<vmem>>) attributes {dimension_semantics = [#tpu.dimension_semantics<parallel>], iteration_bounds = array<i64: 1>, scalar_prefetch = 0 : i64, scratch_operands = 0 : i64, tpu.core_type = #tpu.core_type<tc>, window_params = [{transform_indices = @transform_0, window_bounds = array<i64: 16, 32>}, {pipeline_mode = #tpu.pipeline_mode<synchronous>, transform_indices = @transform_1, window_bounds = array<i64: 32, 128>}, {pipeline_mode = #tpu.pipeline_mode<synchronous>, transform_indices = @transform_2, window_bounds = array<i64: 1, 128>}, {pipeline_mode = #tpu.pipeline_mode<synchronous>, transform_indices = @transform_3, window_bounds = array<i64: 128, 32>}, {pipeline_mode = #tpu.pipeline_mode<synchronous>, transform_indices = @transform_4, window_bounds = array<i64: 1, 32>}, {pipeline_mode = #tpu.pipeline_mode<synchronous>, transform_indices = @transform_5, window_bounds = array<i64: 32, 32>}, {pipeline_mode = #tpu.pipeline_mode<synchronous>, transform_indices = @transform_6, window_bounds = array<i64: 1, 32>}, {transform_indices = @transform_7, window_bounds = array<i64: 16, 32>}]} {
    %c0 = arith.constant 0 : index
    %c0_0 = arith.constant 0 : index
    %0 = vector.load %arg1[%c0, %c0_0] : memref<16x32xf32, #tpu.memory_space<vmem>>, vector<16x32xf32>
    %1 = arith.truncf %0 : vector<16x32xf32> to vector<16x32xbf16>
    %c0_1 = arith.constant 0 : index
    %c0_2 = arith.constant 0 : index
    %2 = vector.load %arg2[%c0_1, %c0_2] : memref<32x128xbf16, #tpu.memory_space<vmem>>, vector<32x128xbf16>
    %cst = arith.constant dense<0.000000e+00> : vector<16x128xf32>
    %3 = tpu.matmul %1, %2, %cst {dimension_numbers = #tpu.dot_dimension_numbers<[1], [0], [0], [1], [0, 0, 1, 1], [], []>} : vector<16x32xbf16>, vector<32x128xbf16>, vector<16x128xf32> -> vector<16x128xf32>
    %c0_3 = arith.constant 0 : index
    %c0_4 = arith.constant 0 : index
    %4 = vector.load %arg3[%c0_3, %c0_4] : memref<1x128xf32, #tpu.memory_space<vmem>>, vector<1x128xf32>
    %5 = vector.broadcast %4 : vector<1x128xf32> to vector<16x128xf32>
    %6 = arith.addf %3, %5 : vector<16x128xf32>
    %cst_5 = arith.constant 0.000000e+00 : f32
    %7 = vector.broadcast %cst_5 : f32 to vector<16x128xf32>
    %8 = arith.maximumf %6, %7 : vector<16x128xf32>
    %9 = arith.truncf %8 : vector<16x128xf32> to vector<16x128xbf16>
    %c0_6 = arith.constant 0 : index
    %c0_7 = arith.constant 0 : index
    %10 = vector.load %arg4[%c0_6, %c0_7] : memref<128x32xbf16, #tpu.memory_space<vmem>>, vector<128x32xbf16>
    %cst_8 = arith.constant dense<0.000000e+00> : vector<16x32xf32>
    %11 = tpu.matmul %9, %10, %cst_8 {dimension_numbers = #tpu.dot_dimension_numbers<[1], [0], [0], [1], [0, 0, 1, 1], [], []>} : vector<16x128xbf16>, vector<128x32xbf16>, vector<16x32xf32> -> vector<16x32xf32>
    %c0_9 = arith.constant 0 : index
    %c0_10 = arith.constant 0 : index
    %12 = vector.load %arg5[%c0_9, %c0_10] : memref<1x32xf32, #tpu.memory_space<vmem>>, vector<1x32xf32>
    %13 = vector.broadcast %12 : vector<1x32xf32> to vector<16x32xf32>
    %14 = arith.addf %11, %13 : vector<16x32xf32>
    %cst_11 = arith.constant 0.000000e+00 : f32
    %15 = vector.broadcast %cst_11 : f32 to vector<16x32xf32>
    %16 = arith.maximumf %14, %15 : vector<16x32xf32>
    %17 = arith.truncf %16 : vector<16x32xf32> to vector<16x32xbf16>
    %c0_12 = arith.constant 0 : index
    %c0_13 = arith.constant 0 : index
    %18 = vector.load %arg6[%c0_12, %c0_13] : memref<32x32xbf16, #tpu.memory_space<vmem>>, vector<32x32xbf16>
    %cst_14 = arith.constant dense<0.000000e+00> : vector<16x32xf32>
    %19 = tpu.matmul %17, %18, %cst_14 {dimension_numbers = #tpu.dot_dimension_numbers<[1], [0], [0], [1], [0, 0, 1, 1], [], []>} : vector<16x32xbf16>, vector<32x32xbf16>, vector<16x32xf32> -> vector<16x32xf32>
    %c0_15 = arith.constant 0 : index
    %c0_16 = arith.constant 0 : index
    %20 = vector.load %arg7[%c0_15, %c0_16] : memref<1x32xf32, #tpu.memory_space<vmem>>, vector<1x32xf32>
    %21 = vector.broadcast %20 : vector<1x32xf32> to vector<16x32xf32>
    %22 = arith.addf %19, %21 : vector<16x32xf32>
    %c0_17 = arith.constant 0 : index
    %c0_18 = arith.constant 0 : index
    %23 = vector.load %arg8[%c0_17, %c0_18] : memref<16x32xf32, #tpu.memory_space<vmem>>, vector<16x32xf32>
    tpu.vector_store %arg8[%c0_17, %c0_18], %22 {strides = array<i32>} : memref<16x32xf32, #tpu.memory_space<vmem>>, vector<16x32xf32>,
    return
  }
  func.func @transform_0(%arg0: i32) -> (i32, i32) {
    %c0_i32 = arith.constant 0 : i32
    %c0_i32_0 = arith.constant 0 : i32
    return %arg0, %c0_i32 : i32, i32
  }
  func.func @transform_1(%arg0: i32) -> (i32, i32) {
    %c0_i32 = arith.constant 0 : i32
    %c0_i32_0 = arith.constant 0 : i32
    %c0_i32_1 = arith.constant 0 : i32
    return %c0_i32, %c0_i32_0 : i32, i32
  }
  func.func @transform_2(%arg0: i32) -> (i32, i32) {
    %c0_i32 = arith.constant 0 : i32
    %c0_i32_0 = arith.constant 0 : i32
    %c0_i32_1 = arith.constant 0 : i32
    return %c0_i32, %c0_i32_0 : i32, i32
  }
  func.func @transform_3(%arg0: i32) -> (i32, i32) {
    %c0_i32 = arith.constant 0 : i32
    %c0_i32_0 = arith.constant 0 : i32
    %c0_i32_1 = arith.constant 0 : i32
    return %c0_i32, %c0_i32_0 : i32, i32
  }
  func.func @transform_4(%arg0: i32) -> (i32, i32) {
    %c0_i32 = arith.constant 0 : i32
    %c0_i32_0 = arith.constant 0 : i32
    %c0_i32_1 = arith.constant 0 : i32
    return %c0_i32, %c0_i32_0 : i32, i32
  }
  func.func @transform_5(%arg0: i32) -> (i32, i32) {
    %c0_i32 = arith.constant 0 : i32
    %c0_i32_0 = arith.constant 0 : i32
    %c0_i32_1 = arith.constant 0 : i32
    return %c0_i32, %c0_i32_0 : i32, i32
  }
  func.func @transform_6(%arg0: i32) -> (i32, i32) {
    %c0_i32 = arith.constant 0 : i32
    %c0_i32_0 = arith.constant 0 : i32
    %c0_i32_1 = arith.constant 0 : i32
    return %c0_i32, %c0_i32_0 : i32, i32
  }
  func.func @transform_7(%arg0: i32) -> (i32, i32) {
    %c0_i32 = arith.constant 0 : i32
    %c0_i32_0 = arith.constant 0 : i32
    return %arg0, %c0_i32 : i32, i32
  }
}

</mosaic_0001>

<bundles_post_ra>
// kernel: tpu_custom_call.1
= control target key start
LH: loop header
LB: loop body
LE: loop exit
PB: predicated region body
PF: predicated region fallthrough
CT: control target
= control target key end

     0   :  { %v411_v1 = vmov 0.0   ;;  %vm412_vm0 = vmmov 0   ;;  %vm54_vm1 = vcmask 261120   ;;  %s526_s0 = inlined_call_operand.vmem [shape: f32[16,32], index: 0, kind: input, shape index: {}]   ;;  %s527_s1 = inlined_call_operand.vmem [shape: bf16[32,128], index: 1, kind: input, shape index: {}]   ;;  %s528_s2 = inlined_call_operand.vmem [shape: f32[1,128], index: 2, kind: input, shape index: {}]   ;;  %s529_s3 = inlined_call_operand.vmem [shape: bf16[128,32], index: 3, kind: input, shape index: {}]   ;;  %s530_s4 = inlined_call_operand.vmem [shape: f32[1,32], index: 4, kind: input, shape index: {}]   ;;  %s531_s5 = inlined_call_operand.vmem [shape: bf16[32,32], index: 5, kind: input, shape index: {}]   ;;  %s532_s6 = inlined_call_operand.vmem [shape: f32[1,32], index: 6, kind: input, shape index: {}]   ;;  %s533_s7 = inlined_call_operand.hbm [shape: f32[16,32], index: 7, kind: output, shape index: {}]  }
   0x1   :  { %v375_v0 = vld [vmem:[%s527_s1] sm:$0xff]   ;;  %334 = vmatprep.subr.bf16.mxu0 %v411_v1  ;;  %v376_v2 = vld [vmem:[%s527_s1 + $0x8] sm:$0xff]   ;;  %342 = vmatprep.subr.bf16.mxu1 %v411_v1  ;;  %v379_v8 = vld [vmem:[%s529_s3 + $0x10] sm:$0xff]  }
   0x2   :  { %335 = vmatpush3.bf16.msra.mxu0 %v375_v0  ;;  %338 = vmatprep.mubr.msk.bf16.mxu0 %vm412_vm0, %v411_v1  ;;  %v28_v3 = vld [vmem:[%s526_s0] sm:$0xff]  ;;  %v29_v4 = vld [vmem:[%s526_s0 + $0x8] sm:$0xff] }
   0x3   :  { %336 = vmatprep.subr.bf16.mxu0 %v411_v1  ;;  %v377_v5 = vld [vmem:[%s529_s3] sm:$0xff]   ;;  %358 = vmatprep.mubr.msk.bf16.mxu1 %vm412_vm0, %v411_v1  ;;  %v30_v6 = vpack.c.bf16 %v29_v4, %v28_v3  ;;  %v378_v7 = vld [vmem:[%s529_s3 + $0x8] sm:$0xff]  }
   0x4   :  { %343 = vmatpush3.bf16.msra.mxu1 %v377_v5 }
   0x5   :  { %344 = vmatprep.subr.bf16.mxu1 %v411_v1 }
   0x6   :  { %337 = vmatpush3.bf16.msra.mxu0 %v376_v2 }
   0x7   :  { %362 = vmatprep.subr.bf16.mxu0 %v411_v1 }
   0x8   :  { %345 = vmatpush3.bf16.msra.mxu1 %v378_v7 }
   0x9   :  { %339 = vmatmul.mubr.msk.bf16.vlgmr.msra.gmra.mrb[0].mxu0 %vm54_vm1, %v30_v6  ;;  %346 = vmatprep.subr.bf16.mxu1 %v411_v1 }
   0xa   :  { %366 = vmatprep.mubr.msk.bf16.mxu0 %vm412_vm0, %v411_v1 }
   0xb   :  { %12 = vsyncpa [#allocation3], 0  ;;  %v380_v9 = vld [vmem:[%s529_s3 + $0x18] sm:$0xff]   ;;  %v381_v10 = vld [vmem:[%s529_s3 + $0x20] sm:$0xff]  }
   0xc   :  { %347 = vmatpush3.bf16.msra.mxu1 %v379_v8  ;;  %v382_v11 = vld [vmem:[%s529_s3 + $0x28] sm:$0xff]   ;;  %v383_v12 = vld [vmem:[%s529_s3 + $0x30] sm:$0xff]   ;;  %v384_v13 = vld [vmem:[%s529_s3 + $0x38] sm:$0xff]  }
   0xd   :  { %348 = vmatprep.subr.bf16.mxu1 %v411_v1  ;;  %v302_v14 = vld [vmem:[%s528_s2] ss:$0 sm:$0xff]  ;;  %v386_v25 = vld [vmem:[%s531_s5 + $0x8] sm:$0xff]  }
   0xe   :  { %v385_v24 = vld [vmem:[%s531_s5] sm:$0xff]   ;;  %s413_s5 = smov [#allocation2]  }
   0xf   :  { %363 = vmatpush3.bf16.msra.mxu0 %v385_v24  ;;  %v306_v26 = vld [vmem:[%s530_s4] ss:$0 sm:$0xff]  ;;  %s291_s8 = sshll.u32 %s413_s5, 4  ;;  %s292_s8 = int_to_ptr.vmem [resolvable:$true] %s291_s8 }
  0x10   :  { %349 = vmatpush3.bf16.msra.mxu1 %v380_v9  ;;  %364 = vmatprep.subr.bf16.mxu0 %v411_v1  ;;  %v315_v36 = vld [vmem:[%s532_s6] ss:$0 sm:$0xff]  ;;  %s387_s4 = scalar_lea.vmem %s292_s8, 256  ;;  %p392_p1 = scmp.lt.s32.totalorder %s292_s8, %s292_s8 }
  0x11   :  { %350 = vmatprep.subr.bf16.mxu1 %v411_v1  ;;  %p388_p0 = scmp.ne.s32.totalorder %s292_s8, %s387_s4  ;;  %p393_p2 = scmp.lt.s32.totalorder %s387_s4, %s387_s4 }
  0x13   :  { %365 = vmatpush3.bf16.msra.mxu0 %v386_v25  ;;  %p394_p3 = por %p393_p2, %p392_p1 }
  0x14   :  { %351 = vmatpush3.bf16.msra.mxu1 %v381_v10 }
  0x15   :  { %352 = vmatprep.subr.bf16.mxu1 %v411_v1  ;;  %p395_p4 = pnand %p394_p3, %p388_p0 }
  0x18   :  { %353 = vmatpush3.bf16.msra.mxu1 %v382_v11 }
  0x19   :  { %354 = vmatprep.subr.bf16.mxu1 %v411_v1 }
  0x1c   :  { %355 = vmatpush3.bf16.msra.mxu1 %v383_v12 }
  0x1d   :  { %356 = vmatprep.subr.bf16.mxu1 %v411_v1 }
  0x20   :  { %357 = vmatpush3.bf16.msra.mxu1 %v384_v13 }
  0xdc   :  { %v92_v15 = vpop.f32.mrb[0].mxu0 }
  0xdd   :  { %v93_v16 = vadd.f32 %v302_v14, %v92_v15  ;;  %v340_v17 = vpop.f32.mrb[1].mxu0 }
  0xde   :  { %v95_v18 = vpop.f32.mrb[2].mxu0 }
  0xdf   :  { %v96_v19 = vadd.f32 %v302_v14, %v95_v18  ;;  %v341_v20 = vpop.f32.mrb[3].mxu0  ;;  %v99_v21 = vmax.f32 %v93_v16, 0.0 }
  0xe1   :  { %v100_v22 = vmax.f32 %v96_v19, 0.0 }
  0xe3   :  { %v101_v23 = vpack.c.bf16 %v100_v22, %v99_v21 }
  0xe5   :  { %359 = vmatmul.mubr.bf16.vlgmr.msra.gmra.mrb[0].mxu1 %v101_v23 }
 0x1b8   :  { %v207_v27 = vpop.f32.mrb[0].mxu1 }
 0x1b9   :  { %v208_v28 = vadd.f32 %v306_v26, %v207_v27  ;;  %v360_v29 = vpop.f32.mrb[1].mxu1 }
 0x1ba   :  { %v210_v30 = vpop.f32.mrb[2].mxu1 }
 0x1bb   :  { %v211_v31 = vadd.f32 %v306_v26, %v210_v30  ;;  %v361_v32 = vpop.f32.mrb[3].mxu1  ;;  %v214_v33 = vmax.f32 %v208_v28, 0.0 }
 0x1bd   :  { %v215_v34 = vmax.f32 %v211_v31, 0.0 }
 0x1bf   :  { %v216_v35 = vpack.c.bf16 %v215_v34, %v214_v33 }
 0x1c1   :  { %367 = vmatmul.mubr.msk.bf16.vlgmr.msra.gmra.mrb[4].mxu0 %vm54_vm1, %v216_v35 }
 0x294   :  { %v277_v37 = vpop.f32.mrb[4].mxu0 }
 0x295   :  { %v278_v38 = vadd.f32 %v315_v36, %v277_v37  ;;  %v368_v39 = vpop.f32.mrb[5].mxu0 }
 0x296   :  { %v280_v40 = vpop.f32.mrb[6].mxu0 }
 0x297   :  { %284 = vst.msk [vmem:[#allocation2] sm:$0xff] %vm54_vm1, %v278_v38  ;;  %v281_v41 = vadd.f32 %v315_v36, %v280_v40  ;;  %v369_v42 = vpop.f32.mrb[7].mxu0 }
 0x299   :  { %285 = vst.msk [vmem:[#allocation2 + $0x8] sm:$0xff] %vm54_vm1, %v281_v41 }
 0x29a   :  { %398 = shalt.err (!%p395_p4)
}
 0x29b   :  { %s399_s10 = scalar_lea.hbm %s533_s7, 256 }
 0x29c   :  { %p400_p5 = scmp.ne.s32.totalorder %s533_s7, %s399_s10  ;;  %p403_p6 = scmp.lt.u32.totalorder %s399_s10, %s533_s7 }
 0x29e   :  { %p405_p7 = pnand %p403_p6, %p400_p5 }
 0x2a0   :  { %408 = shalt.err (!%p405_p7)
}
 0x2a1   :  { %s414_s0 = smov 128   ;;  %s415_s14 = smov 8  }
 0x2a2   :  { %297 = dma.vmem_to_hbm [thread:$0]  %s292_s8, 256, %s533_s7, [#allocation3], %s414_s0, %s414_s0, %s415_s14  }
 0x2a3   :  { %409 = dma.done.wait [#allocation3], 256  }
 0x2a4   :  { %410 = vsyncadd [#allocation3], 4294967040 }
 0x2a5   :  { %301 = vsyncpa [#allocation3], 1 }

</bundles_post_ra>
